<compile_context>
chip_gen: v5e
topology: v5e:2x2
jax: 0.10.0
libtpu: 0.0.40
codegen_flags: <defaults>
</compile_context>

<pallas_src>
import jax
import jax.numpy as jnp
from jax.experimental import pallas as pl
from jax.experimental.pallas import tpu as pltpu

BN_EPS = 1e-5


def _bn_relu(x, gamma, beta):
    # Train-mode BatchNorm1d (biased variance, eps=1e-5) fused with ReLU.
    # Single-pass stats: mean and E[x^2] are independent axis-0 reductions,
    # so the variance reduce is not serialized behind the mean reduce.
    mean = jnp.mean(x, axis=0, keepdims=True)
    mean_sq = jnp.mean(x * x, axis=0, keepdims=True)
    var = mean_sq - mean * mean
    inv = jax.lax.rsqrt(var + BN_EPS)
    return jnp.maximum((x - mean) * inv * gamma + beta, 0.0)


def routing_kernel(x_ref, w1_ref, w2_ref, w3_ref, vec_ref, out_ref):
    """4-layer router MLP; everything resident in VMEM (no grid).

    vec_ref is an (8, L) slab packing all per-feature vectors into one DMA:
      row 0: gamma1 (L)      row 1: beta1 (L)
      row 2: gamma2 (n_ft)   row 3: beta2 (n_ft)   (lane-padded to L)
      row 4: gamma3 (L)      row 5: beta3 (L)
      row 6: w4^T   (L)      row 7: [b4, 0, ...]
    Biases b1/b2/b3 are intentionally absent: a constant per-column offset
    followed by train-mode BatchNorm is removed by the batch-mean subtraction.
    """
    n_ft = w2_ref.shape[1]
    x = x_ref[...]
    vec = vec_ref[...]

    # Linear(F -> L) -> BN -> ReLU   (pre-BN bias is mathematically dead)
    h = jnp.dot(x, w1_ref[...], preferred_element_type=jnp.float32)
    h = _bn_relu(h, vec[0:1, :], vec[1:2, :])

    # Linear(L -> n_ft) -> BN -> ReLU
    h = jnp.dot(h, w2_ref[...], preferred_element_type=jnp.float32)
    h = _bn_relu(h, vec[2:3, :n_ft], vec[3:4, :n_ft])

    # Linear(n_ft -> L) -> BN -> ReLU
    h = jnp.dot(h, w3_ref[...], preferred_element_type=jnp.float32)
    h = _bn_relu(h, vec[4:5, :], vec[5:6, :])

    # Linear(L -> 1) + Sigmoid as VPU multiply + lane (XLU) reduction:
    # skips the MXU for a single output column.
    z = jnp.sum(h * vec[6:7, :], axis=-1, keepdims=True) + vec[7:8, 0:1]
    out_ref[...] = jax.nn.sigmoid(z)


def _pack_vector_params(params, n_labels):
    """Pack all (1, dim) vector params + w4 + b4 into one (8, n_labels) slab."""
    L = n_labels

    def lane_pad(v):
        v = v.reshape(1, -1)
        return jnp.pad(v, ((0, 0), (0, L - v.shape[1])))

    return jnp.concatenate(
        [
            params["g1"].reshape(1, L),
            params["be1"].reshape(1, L),
            lane_pad(params["g2"]),
            lane_pad(params["be2"]),
            params["g3"].reshape(1, L),
            params["be3"].reshape(1, L),
            params["w4"].reshape(1, L),  # (L, 1) -> (1, L)
            lane_pad(params["b4"]),
        ],
        axis=0,
    ).astype(jnp.float32)


@jax.jit
def imagenet_routing_b2(t_logits, t_ft, params):
    """Forward pass of ImageNet_Routing_B2. t_logits is unused (matches module)."""
    del t_logits
    B = t_ft.shape[0]
    n_labels = params["w1"].shape[1]
    vec = _pack_vector_params(params, n_labels)

    vmem = pl.BlockSpec(memory_space=pltpu.MemorySpace.VMEM)
    # NOTE: if this router is invoked many times per step, the biggest further
    # win is keeping the weights VMEM-resident across calls (cross-call
    # prefetch / batching many evaluations into one pallas_call); out of scope
    # for this single-shot script.
    gate = pl.pallas_call(
        routing_kernel,
        out_shape=jax.ShapeDtypeStruct((B, 1), jnp.float32),
        in_specs=[vmem] * 5,
        out_specs=vmem,
    )(t_ft, params["w1"], params["w2"], params["w3"], vec)
    return gate


def init_params(key, num_features, n_labels, n_ft=64):
    """Deterministic parameter init (PyTorch-style uniform for Linear)."""

    def linear(k, fan_in, fan_out):
        kw, kb = jax.random.split(k)
        bound = 1.0 / jnp.sqrt(float(fan_in))
        # Stored pre-transposed as [in, out].
        w = jax.random.uniform(kw, (fan_in, fan_out), jnp.float32, -bound, bound)
        b = jax.random.uniform(kb, (1, fan_out), jnp.float32, -bound, bound)
        return w, b

    def bn(k, dim):
        # Fresh BatchNorm1d: weight=1, bias=0. Perturb slightly but
        # deterministically so the affine path is exercised.
        kg, kb = jax.random.split(k)
        gamma = 1.0 + 0.01 * jax.random.normal(kg, (1, dim), jnp.float32)
        beta = 0.01 * jax.random.normal(kb, (1, dim), jnp.float32)
        return gamma, beta

    k1, k2, k3, k4, k5, k6, k7 = jax.random.split(key, 7)
    w1, b1 = linear(k1, num_features, n_labels)
    g1, be1 = bn(k2, n_labels)
    w2, b2 = linear(k3, n_labels, n_ft)
    g2, be2 = bn(k4, n_ft)
    w3, b3 = linear(k5, n_ft, n_labels)
    g3, be3 = bn(k6, n_labels)
    w4, b4 = linear(k7, n_labels, 1)
    return {
        "w1": w1, "b1": b1, "g1": g1, "be1": be1,
        "w2": w2, "b2": b2, "g2": g2, "be2": be2,
        "w3": w3, "b3": b3, "g3": g3, "be3": be3,
        "w4": w4, "b4": b4,
    }


def reference_exact(t_ft, params):
    """Pure-JAX reference with the same rearranged math as the kernel."""

    def bn(x, g, b):
        mean = jnp.mean(x, axis=0, keepdims=True)
        var = jnp.mean(x * x, axis=0, keepdims=True) - mean * mean
        return (x - mean) * jax.lax.rsqrt(var + BN_EPS) * g + b

    h = jnp.maximum(bn(t_ft @ params["w1"], params["g1"], params["be1"]), 0.0)
    h = jnp.maximum(bn(h @ params["w2"], params["g2"], params["be2"]), 0.0)
    h = jnp.maximum(bn(h @ params["w3"], params["g3"], params["be3"]), 0.0)
    return jax.nn.sigmoid(h @ params["w4"] + params["b4"])


def reference_pytorch(t_ft, params):
    """PyTorch-faithful math: pre-BN biases included, two-pass variance."""

    def bn(x, g, b):
        mean = jnp.mean(x, axis=0, keepdims=True)
        var = jnp.mean((x - mean) ** 2, axis=0, keepdims=True)
        return (x - mean) * jax.lax.rsqrt(var + BN_EPS) * g + b

    h = t_ft @ params["w1"] + params["b1"]
    h = jnp.maximum(bn(h, params["g1"], params["be1"]), 0.0)
    h = h @ params["w2"] + params["b2"]
    h = jnp.maximum(bn(h, params["g2"], params["be2"]), 0.0)
    h = h @ params["w3"] + params["b3"]
    h = jnp.maximum(bn(h, params["g3"], params["be3"]), 0.0)
    return jax.nn.sigmoid(h @ params["w4"] + params["b4"])


if __name__ == "__main__":
    # Small shapes consistent with the module: batch=8, num_features=32,
    # n_labels=128, n_ft=64.
    B, NUM_FEATURES, N_LABELS = 8, 32, 128

    key = jax.random.PRNGKey(0)
    k_ft, k_logits, k_params = jax.random.split(key, 3)

    t_ft = jax.random.normal(k_ft, (B, NUM_FEATURES), jnp.float32)
    t_logits = jax.random.normal(k_logits, (B, N_LABELS), jnp.float32)  # unused
    params = init_params(k_params, NUM_FEATURES, N_LABELS)

    gate = imagenet_routing_b2(t_logits, t_ft, params)
    gate = jax.block_until_ready(gate)
    assert gate.shape == (B, 1), gate.shape

    # Kernel vs. identical-math reference (tight tolerance).
    ref_exact = reference_exact(t_ft, params)
    assert jnp.allclose(gate, ref_exact, atol=1e-5, rtol=1e-5), "mismatch vs exact reference"

    # Kernel vs. PyTorch-faithful reference: dead-bias removal and single-pass
    # variance are algebraically equivalent, so only rounding differs.
    ref_pt = reference_pytorch(t_ft, params)
    assert jnp.allclose(gate, ref_pt, atol=1e-4, rtol=1e-4), "mismatch vs PyTorch-style reference"

    print("KERNEL_OK")
</pallas_src>

<mosaic_0001>
module attributes {stable_mosaic.version = 11 : i64} {
  func.func @routing_kernel(%arg0: memref<8x32xf32, #tpu.memory_space<vmem>>, %arg1: memref<32x128xf32, #tpu.memory_space<vmem>>, %arg2: memref<128x64xf32, #tpu.memory_space<vmem>>, %arg3: memref<64x128xf32, #tpu.memory_space<vmem>>, %arg4: memref<8x128xf32, #tpu.memory_space<vmem>>, %arg5: memref<8x1xf32, #tpu.memory_space<vmem>>) attributes {dimension_semantics = [], scalar_prefetch = 0 : i64, scratch_operands = 0 : i64, tpu.core_type = #tpu.core_type<tc>} {
    %c0 = arith.constant 0 : index
    %c0_0 = arith.constant 0 : index
    %0 = vector.load %arg0[%c0, %c0_0] : memref<8x32xf32, #tpu.memory_space<vmem>>, vector<8x32xf32>
    %c0_1 = arith.constant 0 : index
    %c0_2 = arith.constant 0 : index
    %1 = vector.load %arg4[%c0_1, %c0_2] : memref<8x128xf32, #tpu.memory_space<vmem>>, vector<8x128xf32>
    %c0_3 = arith.constant 0 : index
    %c0_4 = arith.constant 0 : index
    %2 = vector.load %arg1[%c0_3, %c0_4] : memref<32x128xf32, #tpu.memory_space<vmem>>, vector<32x128xf32>
    %cst = arith.constant dense<0.000000e+00> : vector<8x128xf32>
    %3 = tpu.matmul %0, %2, %cst {dimension_numbers = #tpu.dot_dimension_numbers<[1], [0], [0], [1], [0, 0, 1, 1], [], []>} : vector<8x32xf32>, vector<32x128xf32>, vector<8x128xf32> -> vector<8x128xf32>
    %4 = vector.extract_strided_slice %1 {offsets = [0, 0], sizes = [1, 128], strides = [1, 1]} : vector<8x128xf32> to vector<1x128xf32>
    %5 = vector.extract_strided_slice %1 {offsets = [1, 0], sizes = [1, 128], strides = [1, 1]} : vector<8x128xf32> to vector<1x128xf32>
    %cst_5 = arith.constant dense<0.000000e+00> : vector<128xf32>
    %6 = vector.multi_reduction <add>, %3, %cst_5 [0] : vector<8x128xf32> to vector<128xf32>
    %7 = vector.shape_cast %6 : vector<128xf32> to vector<1x128xf32>
    %cst_6 = arith.constant 8.000000e+00 : f32
    %8 = vector.broadcast %cst_6 : f32 to vector<1x128xf32>
    %9 = arith.divf %7, %8 : vector<1x128xf32>
    %10 = arith.mulf %3, %3 : vector<8x128xf32>
    %cst_7 = arith.constant dense<0.000000e+00> : vector<128xf32>
    %11 = vector.multi_reduction <add>, %10, %cst_7 [0] : vector<8x128xf32> to vector<128xf32>
    %12 = vector.shape_cast %11 : vector<128xf32> to vector<1x128xf32>
    %cst_8 = arith.constant 8.000000e+00 : f32
    %13 = vector.broadcast %cst_8 : f32 to vector<1x128xf32>
    %14 = arith.divf %12, %13 : vector<1x128xf32>
    %15 = arith.mulf %9, %9 : vector<1x128xf32>
    %16 = arith.subf %14, %15 : vector<1x128xf32>
    %cst_9 = arith.constant 9.99999974E-6 : f32
    %17 = vector.broadcast %cst_9 : f32 to vector<1x128xf32>
    %18 = arith.addf %16, %17 : vector<1x128xf32>
    %19 = math.rsqrt %18 : vector<1x128xf32>
    %20 = vector.broadcast %9 : vector<1x128xf32> to vector<8x128xf32>
    %21 = arith.subf %3, %20 : vector<8x128xf32>
    %22 = vector.broadcast %19 : vector<1x128xf32> to vector<8x128xf32>
    %23 = arith.mulf %21, %22 : vector<8x128xf32>
    %24 = vector.broadcast %4 : vector<1x128xf32> to vector<8x128xf32>
    %25 = arith.mulf %23, %24 : vector<8x128xf32>
    %26 = vector.broadcast %5 : vector<1x128xf32> to vector<8x128xf32>
    %27 = arith.addf %25, %26 : vector<8x128xf32>
    %cst_10 = arith.constant 0.000000e+00 : f32
    %28 = vector.broadcast %cst_10 : f32 to vector<8x128xf32>
    %29 = arith.maximumf %27, %28 : vector<8x128xf32>
    %c0_11 = arith.constant 0 : index
    %c0_12 = arith.constant 0 : index
    %30 = vector.load %arg2[%c0_11, %c0_12] : memref<128x64xf32, #tpu.memory_space<vmem>>, vector<128x64xf32>
    %cst_13 = arith.constant dense<0.000000e+00> : vector<8x64xf32>
    %31 = tpu.matmul %29, %30, %cst_13 {dimension_numbers = #tpu.dot_dimension_numbers<[1], [0], [0], [1], [0, 0, 1, 1], [], []>} : vector<8x128xf32>, vector<128x64xf32>, vector<8x64xf32> -> vector<8x64xf32>
    %32 = vector.extract_strided_slice %1 {offsets = [2, 0], sizes = [1, 64], strides = [1, 1]} : vector<8x128xf32> to vector<1x64xf32>
    %33 = vector.extract_strided_slice %1 {offsets = [3, 0], sizes = [1, 64], strides = [1, 1]} : vector<8x128xf32> to vector<1x64xf32>
    %cst_14 = arith.constant dense<0.000000e+00> : vector<64xf32>
    %34 = vector.multi_reduction <add>, %31, %cst_14 [0] : vector<8x64xf32> to vector<64xf32>
    %35 = vector.shape_cast %34 : vector<64xf32> to vector<1x64xf32>
    %cst_15 = arith.constant 8.000000e+00 : f32
    %36 = vector.broadcast %cst_15 : f32 to vector<1x64xf32>
    %37 = arith.divf %35, %36 : vector<1x64xf32>
    %38 = arith.mulf %31, %31 : vector<8x64xf32>
    %cst_16 = arith.constant dense<0.000000e+00> : vector<64xf32>
    %39 = vector.multi_reduction <add>, %38, %cst_16 [0] : vector<8x64xf32> to vector<64xf32>
    %40 = vector.shape_cast %39 : vector<64xf32> to vector<1x64xf32>
    %cst_17 = arith.constant 8.000000e+00 : f32
    %41 = vector.broadcast %cst_17 : f32 to vector<1x64xf32>
    %42 = arith.divf %40, %41 : vector<1x64xf32>
    %43 = arith.mulf %37, %37 : vector<1x64xf32>
    %44 = arith.subf %42, %43 : vector<1x64xf32>
    %cst_18 = arith.constant 9.99999974E-6 : f32
    %45 = vector.broadcast %cst_18 : f32 to vector<1x64xf32>
    %46 = arith.addf %44, %45 : vector<1x64xf32>
    %47 = math.rsqrt %46 : vector<1x64xf32>
    %48 = vector.broadcast %37 : vector<1x64xf32> to vector<8x64xf32>
    %49 = arith.subf %31, %48 : vector<8x64xf32>
    %50 = vector.broadcast %47 : vector<1x64xf32> to vector<8x64xf32>
    %51 = arith.mulf %49, %50 : vector<8x64xf32>
    %52 = vector.broadcast %32 : vector<1x64xf32> to vector<8x64xf32>
    %53 = arith.mulf %51, %52 : vector<8x64xf32>
    %54 = vector.broadcast %33 : vector<1x64xf32> to vector<8x64xf32>
    %55 = arith.addf %53, %54 : vector<8x64xf32>
    %cst_19 = arith.constant 0.000000e+00 : f32
    %56 = vector.broadcast %cst_19 : f32 to vector<8x64xf32>
    %57 = arith.maximumf %55, %56 : vector<8x64xf32>
    %c0_20 = arith.constant 0 : index
    %c0_21 = arith.constant 0 : index
    %58 = vector.load %arg3[%c0_20, %c0_21] : memref<64x128xf32, #tpu.memory_space<vmem>>, vector<64x128xf32>
    %cst_22 = arith.constant dense<0.000000e+00> : vector<8x128xf32>
    %59 = tpu.matmul %57, %58, %cst_22 {dimension_numbers = #tpu.dot_dimension_numbers<[1], [0], [0], [1], [0, 0, 1, 1], [], []>} : vector<8x64xf32>, vector<64x128xf32>, vector<8x128xf32> -> vector<8x128xf32>
    %60 = vector.extract_strided_slice %1 {offsets = [4, 0], sizes = [1, 128], strides = [1, 1]} : vector<8x128xf32> to vector<1x128xf32>
    %61 = vector.extract_strided_slice %1 {offsets = [5, 0], sizes = [1, 128], strides = [1, 1]} : vector<8x128xf32> to vector<1x128xf32>
    %cst_23 = arith.constant dense<0.000000e+00> : vector<128xf32>
    %62 = vector.multi_reduction <add>, %59, %cst_23 [0] : vector<8x128xf32> to vector<128xf32>
    %63 = vector.shape_cast %62 : vector<128xf32> to vector<1x128xf32>
    %cst_24 = arith.constant 8.000000e+00 : f32
    %64 = vector.broadcast %cst_24 : f32 to vector<1x128xf32>
    %65 = arith.divf %63, %64 : vector<1x128xf32>
    %66 = arith.mulf %59, %59 : vector<8x128xf32>
    %cst_25 = arith.constant dense<0.000000e+00> : vector<128xf32>
    %67 = vector.multi_reduction <add>, %66, %cst_25 [0] : vector<8x128xf32> to vector<128xf32>
    %68 = vector.shape_cast %67 : vector<128xf32> to vector<1x128xf32>
    %cst_26 = arith.constant 8.000000e+00 : f32
    %69 = vector.broadcast %cst_26 : f32 to vector<1x128xf32>
    %70 = arith.divf %68, %69 : vector<1x128xf32>
    %71 = arith.mulf %65, %65 : vector<1x128xf32>
    %72 = arith.subf %70, %71 : vector<1x128xf32>
    %cst_27 = arith.constant 9.99999974E-6 : f32
    %73 = vector.broadcast %cst_27 : f32 to vector<1x128xf32>
    %74 = arith.addf %72, %73 : vector<1x128xf32>
    %75 = math.rsqrt %74 : vector<1x128xf32>
    %76 = vector.broadcast %65 : vector<1x128xf32> to vector<8x128xf32>
    %77 = arith.subf %59, %76 : vector<8x128xf32>
    %78 = vector.broadcast %75 : vector<1x128xf32> to vector<8x128xf32>
    %79 = arith.mulf %77, %78 : vector<8x128xf32>
    %80 = vector.broadcast %60 : vector<1x128xf32> to vector<8x128xf32>
    %81 = arith.mulf %79, %80 : vector<8x128xf32>
    %82 = vector.broadcast %61 : vector<1x128xf32> to vector<8x128xf32>
    %83 = arith.addf %81, %82 : vector<8x128xf32>
    %cst_28 = arith.constant 0.000000e+00 : f32
    %84 = vector.broadcast %cst_28 : f32 to vector<8x128xf32>
    %85 = arith.maximumf %83, %84 : vector<8x128xf32>
    %86 = vector.extract_strided_slice %1 {offsets = [6, 0], sizes = [1, 128], strides = [1, 1]} : vector<8x128xf32> to vector<1x128xf32>
    %87 = vector.broadcast %86 : vector<1x128xf32> to vector<8x128xf32>
    %88 = arith.mulf %85, %87 : vector<8x128xf32>
    %cst_29 = arith.constant dense<0.000000e+00> : vector<8xf32>
    %89 = vector.multi_reduction <add>, %88, %cst_29 [1] : vector<8x128xf32> to vector<8xf32>
    %90 = vector.shape_cast %89 : vector<8xf32> to vector<8x1xf32>
    %91 = vector.extract_strided_slice %1 {offsets = [7, 0], sizes = [1, 1], strides = [1, 1]} : vector<8x128xf32> to vector<1x1xf32>
    %92 = vector.broadcast %91 : vector<1x1xf32> to vector<8x1xf32>
    %93 = arith.addf %90, %92 : vector<8x1xf32>
    %94 = arith.negf %93 : vector<8x1xf32>
    %95 = math.exp %94 : vector<8x1xf32>
    %cst_30 = arith.constant 1.000000e+00 : f32
    %96 = vector.broadcast %cst_30 : f32 to vector<8x1xf32>
    %97 = arith.addf %96, %95 : vector<8x1xf32>
    %98 = arith.divf %96, %97 : vector<8x1xf32>
    %c0_31 = arith.constant 0 : index
    %c0_32 = arith.constant 0 : index
    %99 = vector.load %arg5[%c0_31, %c0_32] : memref<8x1xf32, #tpu.memory_space<vmem>>, vector<8x1xf32>
    tpu.vector_store %arg5[%c0_31, %c0_32], %98 {strides = array<i32>} : memref<8x1xf32, #tpu.memory_space<vmem>>, vector<8x1xf32>,
    return
  }
}

</mosaic_0001>

<bundles_post_ra>
// kernel: imagenet_routing_b2.1
= control target key start
LH: loop header
LB: loop body
LE: loop exit
PB: predicated region body
PF: predicated region fallthrough
CT: control target
= control target key end

     0   :  { %vm26_vm0 = vcmask 261120   ;;  %v279_v6 = vmov 8.0   ;;  %vm128_vm5 = vcmask 523264   ;;  %vm257_vm15 = vcmask 7168   ;;  %s424_s1 = inlined_call_operand.vmem [shape: f32[32,128], index: 1, kind: input, shape index: {}]   ;;  %s425_s0 = inlined_call_operand.vmem [shape: f32[8,32], index: 0, kind: input, shape index: {}]   ;;  %s426_s2 = inlined_call_operand.vmem [shape: f32[128,64], index: 2, kind: input, shape index: {}]   ;;  %s427_s4 = inlined_call_operand.vmem [shape: f32[8,128], index: 4, kind: input, shape index: {}]   ;;  %s428_s3 = inlined_call_operand.vmem [shape: f32[64,128], index: 3, kind: input, shape index: {}]   ;;  %s429_s5 = inlined_call_operand.vmem [shape: f32[8,1], index: 5, kind: output, shape index: {}]  }
   0x1   :  { %v25_v0 = vld [vmem:[%s424_s1 + $0x18] sm:$0xff]  ;;  %v24_v1 = vld [vmem:[%s424_s1 + $0x10] sm:$0xff]  ;;  %v23_v2 = vld [vmem:[%s424_s1 + $0x8] sm:$0xff]  ;;  %267 = vrcp.f32 %v279_v6 }
   0x2   :  { %42 = vmatpush.msra.mxu0 %v25_v0  ;;  %v22_v3 = vld [vmem:[%s424_s1] sm:$0xff]  ;;  %v107_v5 = vld [vmem:[%s426_s2 + $0x78] sm:$0xff]  ;;  %v106_v7 = vld [vmem:[%s426_s2 + $0x70] sm:$0xff] }
   0x3   :  { %v20_v4 = vld [vmem:[%s425_s0] sm:$0xff]  ;;  %108 = vmatpush.msra.mxu1 %v107_v5  ;;  %v105_v8 = vld [vmem:[%s426_s2 + $0x68] sm:$0xff]  ;;  %v103_v11 = vld [vmem:[%s426_s2 + $0x58] sm:$0xff] }
   0x4   :  { %43 = vmatpush.msra.mxu0 %v24_v1  ;;  %v104_v9 = vld [vmem:[%s426_s2 + $0x60] sm:$0xff]  ;;  %v102_v12 = vld [vmem:[%s426_s2 + $0x50] sm:$0xff]  ;;  %v101_v14 = vld [vmem:[%s426_s2 + $0x48] sm:$0xff] }
   0x5   :  { %109 = vmatpush.msra.mxu1 %v106_v7  ;;  %v100_v15 = vld [vmem:[%s426_s2 + $0x40] sm:$0xff]  ;;  %v99_v17 = vld [vmem:[%s426_s2 + $0x38] sm:$0xff]  ;;  %v98_v21 = vld [vmem:[%s426_s2 + $0x30] sm:$0xff] }
   0x6   :  { %44 = vmatpush.msra.mxu0 %v23_v2  ;;  %v97_v25 = vld [vmem:[%s426_s2 + $0x28] sm:$0xff]  ;;  %v96_v28 = vld [vmem:[%s426_s2 + $0x20] sm:$0xff]  ;;  %v95_v32 = vld [vmem:[%s426_s2 + $0x18] sm:$0xff] }
   0x7   :  { %110 = vmatpush.msra.mxu1 %v105_v8  ;;  %v268_v10 = vpop.eup %267  ;;  %v94_v33 = vld [vmem:[%s426_s2 + $0x10] sm:$0xff]  ;;  %v93_v36 = vld [vmem:[%s426_s2 + $0x8] sm:$0xff]  ;;  %v92_v40 = vld [vmem:[%s426_s2] sm:$0xff] }
   0x8   :  { %45 = vmatpush.msra.mxu0 %v22_v3  ;;  %v57_v13 = vmul.f32 8.0, %v268_v10  ;;  %vm61_vm1 = vweird.f32 %v268_v10  ;;  %v380_v52 = vld [vmem:[%s427_s4] sm:$0xff]  ;;  %v173_v63 = vld [vmem:[%s428_s3 + $0x38] sm:$0xff]  ;;  %v172_v3 = vld [vmem:[%s428_s3 + $0x30] sm:$0xff] }
   0x9   :  { %263 = vmatmul.msk.f32.vlgmr.msra.gmra.mxu0 %vm26_vm0, %v20_v4  ;;  %111 = vmatpush.msra.mxu1 %v104_v9  ;;  %v87_v55 = vperm.slane %v380_v52, 0  ;;  %v89_v58 = vperm.slane %v380_v52, 1  ;;  %v171_v7 = vld [vmem:[%s428_s3 + $0x28] sm:$0xff] }
   0xa   :  { %v58_v16 = vsub.f32 1.0, %v57_v13  ;;  %185 = vmatpush.msra.mxu2 %v173_v63  ;;  %v169_v13 = vld [vmem:[%s428_s3 + $0x18] sm:$0xff] }
   0xb   :  { %112 = vmatpush.msra.mxu1 %v103_v11 }
   0xc   :  { %v59_v22 = vmul.f32 %v268_v10, %v58_v16  ;;  %186 = vmatpush.msra.mxu2 %v172_v3  ;;  %v168_v16 = vld [vmem:[%s428_s3 + $0x10] sm:$0xff] }
   0xd   :  { %113 = vmatpush.msra.mxu1 %v102_v12 }
   0xe   :  { %v60_v29 = vadd.f32 %v268_v10, %v59_v22  ;;  %187 = vmatpush.msra.mxu2 %v171_v7 }
   0xf   :  { %114 = vmatpush.msra.mxu1 %v101_v14 }
  0x10   :  { %v370_v37 = vsel %vm61_vm1, %v268_v10, %v60_v29  ;;  %v170_v10 = vld [vmem:[%s428_s3 + $0x20] sm:$0xff] }
  0x11   :  { %115 = vmatpush.msra.mxu1 %v100_v15  ;;  %188 = vmatpush.msra.mxu2 %v170_v10  ;;  %v232_v10 = vperm.slane %v380_v52, 6 }
  0x13   :  { %116 = vmatpush.msra.mxu1 %v99_v17  ;;  %189 = vmatpush.msra.mxu2 %v169_v13  ;;  %v167_v17 = vld [vmem:[%s428_s3 + $0x8] sm:$0xff]  ;;  %v236_v13 = vperm.slane %v380_v52, 7 }
  0x15   :  { %117 = vmatpush.msra.mxu1 %v98_v21  ;;  %190 = vmatpush.msra.mxu2 %v168_v16 }
  0x17   :  { %118 = vmatpush.msra.mxu1 %v97_v25  ;;  %191 = vmatpush.msra.mxu2 %v167_v17 }
  0x19   :  { %119 = vmatpush.msra.mxu1 %v96_v28 }
  0x1b   :  { %120 = vmatpush.msra.mxu1 %v95_v32 }
  0x1d   :  { %121 = vmatpush.msra.mxu1 %v94_v33 }
  0x1f   :  { %122 = vmatpush.msra.mxu1 %v93_v36 }
  0x21   :  { %123 = vmatpush.msra.mxu1 %v92_v40 }
  0x86   :  { %v47_v18 = vpop.f32.mrf.mxu0 }
  0x87   :  { %v50_v19 = vrot.slane %v47_v18, 4  ;;  %v64_v20 = vmul.f32 %v47_v18, %v47_v18 }
  0x89   :  { %v51_v23 = vadd.f32 %v50_v19, %v47_v18  ;;  %v65_v24 = vrot.slane %v64_v20, 4 }
  0x8b   :  { %v52_v26 = vrot.slane %v51_v23, 2  ;;  %v66_v27 = vadd.f32 %v65_v24, %v64_v20  ;;  %v166_v20 = vld [vmem:[%s428_s3] sm:$0xff] }
  0x8c   :  { %192 = vmatpush.msra.mxu2 %v166_v20 }
  0x8d   :  { %v53_v30 = vadd.f32 %v52_v26, %v51_v23  ;;  %v67_v31 = vrot.slane %v66_v27, 2 }
  0x8f   :  { %v54_v34 = vrot.slane %v53_v30, 1  ;;  %v68_v35 = vadd.f32 %v67_v31, %v66_v27 }
  0x91   :  { %v55_v38 = vadd.f32 %v54_v34, %v53_v30  ;;  %v69_v39 = vrot.slane %v68_v35, 1  ;;  %v161_v34 = vperm.slane %v380_v52, 2 }
  0x93   :  { %v63_v41 = vmul.f32 %v370_v37, %v55_v38  ;;  %v70_v42 = vadd.f32 %v69_v39, %v68_v35  ;;  %v163_v38 = vperm.slane %v380_v52, 3 }
  0x95   :  { %v71_v43 = vmul.f32 %v70_v42, %v370_v37  ;;  %v72_v44 = vmul.f32 %v63_v41, %v63_v41  ;;  %v85_v54 = vsub.f32 %v47_v18, %v63_v41 }
  0x97   :  { %v73_v45 = vsub.f32 %v71_v43, %v72_v44 }
  0x99   :  { %v74_v46 = vadd.f32 1e-05, %v73_v45 }
  0x9b   :  { %269 = vrsqrt.f32 %v74_v46  ;;  %vm81_vm3 = vweird.f32 %v74_v46 }
  0xa1   :  { %v270_v47 = vpop.eup %269 }
  0xa2   :  { %v76_v48 = vmul.f32 %v270_v47, %v74_v46  ;;  %vm82_vm2 = vweird.f32 %v270_v47 }
  0xa3   :  { %vm83_vm4 = vmor %vm81_vm3, %vm82_vm2 }
  0xa4   :  { %v77_v49 = vmul.f32 %v270_v47, %v76_v48 }
  0xa6   :  { %v78_v50 = vmul.f32 0.5, %v77_v49 }
  0xa8   :  { %v79_v51 = vsub.f32 1.5, %v78_v50 }
  0xaa   :  { %v80_v53 = vmul.f32 %v270_v47, %v79_v51 }
  0xac   :  { %v84_v56 = vsel %vm83_vm4, %v270_v47, %v80_v53 }
  0xad   :  { %v86_v57 = vmul.f32 %v85_v54, %v84_v56 }
  0xaf   :  { %v88_v59 = vmul.f32 %v87_v55, %v86_v57 }
  0xb1   :  { %v90_v60 = vadd.f32 %v89_v58, %v88_v59 }
  0xb3   :  { %v91_v61 = vmax.f32 %v90_v60, 0.0 }
  0xb5   :  { %124 = vmatmul.f32.vlgmr.msra.gmra.mxu1 %v91_v61 }
 0x132   :  { %v125_v62 = vpop.f32.mrf.mxu1 }
 0x133   :  { %v129_v0 = vsel %vm128_vm5, %v125_v62, 0.0  ;;  %v137_v1 = vmul.f32 %v125_v62, %v125_v62 }
 0x134   :  { %v130_v2 = vrot.slane %v129_v0, 4 }
 0x135   :  { %v138_v4 = vsel %vm128_vm5, %v137_v1, 0.0 }
 0x136   :  { %v131_v5 = vadd.f32 %v130_v2, %v129_v0  ;;  %v139_v6 = vrot.slane %v138_v4, 4 }
 0x138   :  { %v132_v8 = vrot.slane %v131_v5, 2  ;;  %v140_v9 = vadd.f32 %v139_v6, %v138_v4 }
 0x13a   :  { %v133_v11 = vadd.f32 %v132_v8, %v131_v5  ;;  %v141_v12 = vrot.slane %v140_v9, 2  ;;  %v227_v5 = vperm.slane %v380_v52, 4 }
 0x13c   :  { %v134_v14 = vrot.slane %v133_v11, 1  ;;  %v142_v15 = vadd.f32 %v141_v12, %v140_v9 }
 0x13e   :  { %v135_v18 = vadd.f32 %v134_v14, %v133_v11  ;;  %v143_v19 = vrot.slane %v142_v15, 1 }
 0x140   :  { %v136_v21 = vmul.f32 %v135_v18, %v370_v37  ;;  %v144_v22 = vadd.f32 %v143_v19, %v142_v15 }
 0x142   :  { %v145_v23 = vmul.f32 %v144_v22, %v370_v37  ;;  %v146_v24 = vmul.f32 %v136_v21, %v136_v21  ;;  %v159_v33 = vsub.f32 %v125_v62, %v136_v21 }
 0x144   :  { %v147_v25 = vsub.f32 %v145_v23, %v146_v24 }
 0x146   :  { %v148_v26 = vadd.f32 1e-05, %v147_v25 }
 0x148   :  { %271 = vrsqrt.f32 %v148_v26  ;;  %vm155_vm7 = vweird.f32 %v148_v26 }
 0x14e   :  { %v272_v27 = vpop.eup %271 }
 0x14f   :  { %v150_v28 = vmul.f32 %v272_v27, %v148_v26  ;;  %vm156_vm6 = vweird.f32 %v272_v27 }
 0x150   :  { %vm157_vm8 = vmor %vm155_vm7, %vm156_vm6 }
 0x151   :  { %v151_v29 = vmul.f32 %v272_v27, %v150_v28 }
 0x153   :  { %v152_v30 = vmul.f32 0.5, %v151_v29 }
 0x155   :  { %v153_v31 = vsub.f32 1.5, %v152_v30 }
 0x157   :  { %v154_v32 = vmul.f32 %v272_v27, %v153_v31 }
 0x159   :  { %v158_v35 = vsel %vm157_vm8, %v272_v27, %v154_v32 }
 0x15a   :  { %v160_v36 = vmul.f32 %v159_v33, %v158_v35 }
 0x15c   :  { %v162_v39 = vmul.f32 %v161_v34, %v160_v36 }
 0x15e   :  { %v164_v40 = vadd.f32 %v163_v38, %v162_v39 }
 0x160   :  { %v165_v41 = vmax.f32 %v164_v40, 0.0 }
 0x162   :  { %264 = vmatmul.msk.f32.vlgmr.msra.gmra.mxu2 %vm128_vm5, %v165_v41 }
 0x1e5   :  { %v194_v42 = vpop.f32.mrf.mxu2 }
 0x1e6   :  { %v197_v43 = vrot.slane %v194_v42, 4  ;;  %v204_v44 = vmul.f32 %v194_v42, %v194_v42 }
 0x1e8   :  { %v198_v45 = vadd.f32 %v197_v43, %v194_v42  ;;  %v205_v46 = vrot.slane %v204_v44, 4 }
 0x1ea   :  { %v199_v47 = vrot.slane %v198_v45, 2  ;;  %v206_v48 = vadd.f32 %v205_v46, %v204_v44 }
 0x1ec   :  { %v200_v49 = vadd.f32 %v199_v47, %v198_v45  ;;  %v207_v50 = vrot.slane %v206_v48, 2 }
 0x1ee   :  { %v201_v51 = vrot.slane %v200_v49, 1  ;;  %v208_v53 = vadd.f32 %v207_v50, %v206_v48 }
 0x1f0   :  { %v202_v54 = vadd.f32 %v201_v51, %v200_v49  ;;  %v209_v55 = vrot.slane %v208_v53, 1 }
 0x1f2   :  { %v203_v56 = vmul.f32 %v202_v54, %v370_v37  ;;  %v210_v57 = vadd.f32 %v209_v55, %v208_v53 }
 0x1f4   :  { %v211_v58 = vmul.f32 %v210_v57, %v370_v37  ;;  %v212_v59 = vmul.f32 %v203_v56, %v203_v56  ;;  %v225_v4 = vsub.f32 %v194_v42, %v203_v56  ;;  %v229_v37 = vperm.slane %v380_v52, 5 }
 0x1f6   :  { %v213_v60 = vsub.f32 %v211_v58, %v212_v59 }
 0x1f8   :  { %v214_v61 = vadd.f32 1e-05, %v213_v60 }
 0x1fa   :  { %273 = vrsqrt.f32 %v214_v61  ;;  %vm221_vm10 = vweird.f32 %v214_v61 }
 0x200   :  { %v274_v62 = vpop.eup %273 }
 0x201   :  { %v216_v63 = vmul.f32 %v274_v62, %v214_v61  ;;  %vm222_vm9 = vweird.f32 %v274_v62 }
 0x202   :  { %vm223_vm11 = vmor %vm221_vm10, %vm222_vm9 }
 0x203   :  { %v217_v0 = vmul.f32 %v274_v62, %v216_v63 }
 0x205   :  { %v218_v1 = vmul.f32 0.5, %v217_v0 }
 0x207   :  { %v219_v2 = vsub.f32 1.5, %v218_v1 }
 0x209   :  { %v220_v3 = vmul.f32 %v274_v62, %v219_v2 }
 0x20b   :  { %v224_v6 = vsel %vm223_vm11, %v274_v62, %v220_v3 }
 0x20c   :  { %v226_v7 = vmul.f32 %v225_v4, %v224_v6 }
 0x20e   :  { %v228_v8 = vmul.f32 %v227_v5, %v226_v7 }
 0x210   :  { %v230_v9 = vadd.f32 %v229_v37, %v228_v8 }
 0x212   :  { %v231_v11 = vmax.f32 %v230_v9, 0.0 }
 0x214   :  { %v233_v12 = vmul.f32 %v232_v10, %v231_v11 }
 0x216   :  { %234 = vadd.xlane.f32.xlu0 %v233_v12 }
 0x289   :  { %v235_v14 = vpop.xlane.xlu0 %234 }
 0x28a   :  { %v237_v15 = vadd.f32 %v236_v13, %v235_v14 }
 0x28c   :  { %v265_v16 = vmul.f32 -1.442695, %v237_v15 }
 0x28e   :  { %275 = vpow2.f32 %v265_v16 }
 0x294   :  { %v276_v17 = vpop.eup %275 }
 0x295   :  { %v241_v18 = vadd.f32 1.0, %v276_v17 }
 0x297   :  { %277 = vrcp.f32 %v241_v18  ;;  %v253_v22 = vand.u32 2147483648, %v241_v18  ;;  %v251_v24 = vand.u32 2147483647, %v241_v18  ;;  %vm247_vm13 = vweird.f32 %v241_v18 }
 0x299   :  { %v254_v26 = vor.u32 1.1754944e-38, %v253_v22  ;;  %vm252_vm0 = vcmp.eq.f32.partialorder %v251_v24, 8.507059e+37 }
 0x29d   :  { %v278_v19 = vpop.eup %277 }
 0x29e   :  { %v243_v20 = vmul.f32 %v278_v19, %v241_v18  ;;  %vm248_vm12 = vweird.f32 %v278_v19 }
 0x29f   :  { %vm249_vm14 = vmor %vm247_vm13, %vm248_vm12 }
 0x2a0   :  { %v244_v21 = vsub.f32 1.0, %v243_v20 }
 0x2a2   :  { %v245_v23 = vmul.f32 %v278_v19, %v244_v21 }
 0x2a4   :  { %v246_v25 = vadd.f32 %v278_v19, %v245_v23 }
 0x2a6   :  { %v250_v52 = vsel %vm249_vm14, %v278_v19, %v246_v25 }
 0x2a7   :  { %v255_v27 = vsel %vm252_vm0, %v254_v26, %v250_v52 }
 0x2a8   :  { %258 = vst.msk [vmem:[%s429_s5] sm:$0xff] %vm257_vm15, %v255_v27 }

</bundles_post_ra>
